<compile_context>
chip_gen: v6e
topology: v6e:2x2x1
jax: 0.10.0
libtpu: 0.0.40
codegen_flags: <defaults>
</compile_context>

<pallas_src>
import functools

import jax
import jax.numpy as jnp
from jax.experimental import pallas as pl
from jax.experimental.pallas import tpu as pltpu


# ---------------------------------------------------------------------------
# Fused multi-head GraphAttentionLayer kernel: `bblk` graphs x ALL heads per step.
# ---------------------------------------------------------------------------
def _gat_fused_kernel(x_ref, bias_ref, w_ref, out_ref, *, heads, hid, alpha,
                      apply_elu):
    bblk, n, f_in = x_ref.shape
    d_h = heads * hid

    x = x_ref[...]                                    # (bblk, N, Fin)   bf16
    bias = bias_ref[...].astype(jnp.float32)          # (bblk, N, N)     0 / -9e15
    w_aug = w_ref[...]                                # (Fin, H*hid+2H)  bf16

    # Projection + folded attention vectors: one bf16 MXU matmul, f32 acc.
    hz = jnp.dot(x.reshape(bblk * n, f_in), w_aug,
                 preferred_element_type=jnp.float32)  # (bblk*N, D_aug)
    hz = hz.reshape(bblk, n, d_h + 2 * heads)

    h_all = hz[..., :d_h]                             # (bblk, N, H*hid)
    e_src = hz[..., d_h:d_h + heads]                  # (bblk, N, H) = h_k @ a1_k
    e_dst = hz[..., d_h + heads:]                     # (bblk, N, H) = h_k @ a2_k

    outs = []
    for k in range(heads):                            # static unroll, small H
        es = e_src[..., k:k + 1]                      # (bblk, N, 1)
        ed = e_dst[..., k:k + 1]                      # (bblk, N, 1)
        e = es + jnp.swapaxes(ed, -1, -2)             # (bblk, N, N)
        e = jnp.where(e > 0, e, alpha * e)            # LeakyReLU(alpha)
        e = e + bias                                  # additive adjacency mask

        m = jnp.max(e, axis=-1, keepdims=True)
        p = jnp.exp(e - m)
        s = jnp.sum(p, axis=-1, keepdims=True)
        attn = p * pl.reciprocal(s, approx=True)      # EUP reciprocal (free slot)

        hk = h_all[..., k * hid:(k + 1) * hid]        # (bblk, N, hid)
        hp = jnp.einsum('bij,bjd->bid',
                        attn.astype(jnp.bfloat16),
                        hk.astype(jnp.bfloat16),
                        preferred_element_type=jnp.float32)
        if apply_elu:                                 # ELU(alpha=1.0)
            hp = jnp.where(hp > 0, hp, jnp.exp(hp) - 1.0)
        outs.append(hp)

    out = outs[0] if heads == 1 else jnp.concatenate(outs, axis=-1)
    out_ref[...] = out.astype(out_ref.dtype)


def _pick_bblk(batch, n, target_rows=256):
    """Graphs per grid step: fill MXU rows, keep >=2 grid steps for megacore."""
    bblk = max(1, min(batch, target_rows // max(n, 1)))
    while batch % bblk:
        bblk -= 1
    if bblk == batch and batch >= 2:      # leave work for v7x's second TC
        bblk = batch // 2
        while batch % bblk:
            bblk -= 1
    return max(bblk, 1)


def gat_fused_layer(x, bias, w_aug, *, heads, hid, alpha, apply_elu,
                    out_dtype=jnp.float32):
    """All heads of one GraphAttentionLayer, batch-blocked over the grid."""
    b, n, f_in = x.shape
    d_aug = w_aug.shape[1]
    d_out = heads * hid
    bblk = _pick_bblk(b, n)
    kernel = functools.partial(_gat_fused_kernel, heads=heads, hid=hid,
                               alpha=alpha, apply_elu=apply_elu)
    return pl.pallas_call(
        kernel,
        out_shape=jax.ShapeDtypeStruct((b, n, d_out), out_dtype),
        grid=(b // bblk,),
        in_specs=[
            pl.BlockSpec((bblk, n, f_in), lambda i: (i, 0, 0)),   # x      (bf16)
            pl.BlockSpec((bblk, n, n), lambda i: (i, 0, 0)),      # bias   (bf16)
            pl.BlockSpec((f_in, d_aug), lambda i: (0, 0)),        # W_aug, resident
        ],
        out_specs=pl.BlockSpec((bblk, n, d_out), lambda i: (i, 0, 0)),
        compiler_params=pltpu.CompilerParams(
            dimension_semantics=("parallel",)),
    )(x, bias, w_aug)


# ---------------------------------------------------------------------------
# Weight folding + full GAT forward.
# ---------------------------------------------------------------------------
def _build_w_aug(head_params):
    """Stack head projections and fold a1/a2: (Fin, H*hid + 2H), bf16."""
    ws = [W for (W, _) in head_params]
    a_src = [W @ a[:W.shape[1]] for (W, a) in head_params]   # (Fin, 1) each
    a_dst = [W @ a[W.shape[1]:] for (W, a) in head_params]
    return jnp.concatenate(ws + a_src + a_dst, axis=1).astype(jnp.bfloat16)


def gat_forward(x, adj, params, *, alpha):
    """GAT.forward (inference). Dropout == identity (training=False)."""
    x = x.astype(jnp.float32)
    # additive mask: 0 where edge, -9e15 where no edge (matches torch `where`)
    bias = jnp.where(adj > 0, 0.0, -9.0e15).astype(jnp.bfloat16)

    heads = len(params["heads"])
    hid = params["heads"][0][0].shape[1]
    out_dim = params["out"][0].shape[1]

    # layer 1: all heads fused + ELU; bf16 slab feeds the next layer directly.
    h1 = gat_fused_layer(x.astype(jnp.bfloat16), bias,
                         _build_w_aug(params["heads"]),
                         heads=heads, hid=hid, alpha=alpha, apply_elu=True,
                         out_dtype=jnp.bfloat16)
    # layer 2: out_att (concat=False) followed by F.elu  ==  apply_elu=True here.
    h2 = gat_fused_layer(h1, bias, _build_w_aug([params["out"]]),
                         heads=1, hid=out_dim, alpha=alpha, apply_elu=True,
                         out_dtype=jnp.float32)
    return h2.mean(axis=-2)                                   # (B, out_dim)


# ---------------------------------------------------------------------------
# References. (1) exact torch-semantics f32; (2) cast-matched bf16 (mirrors kernel).
# ---------------------------------------------------------------------------
def _gat_layer_ref(x, adj, W, a, alpha, apply_elu):
    h = x @ W
    f_out = W.shape[1]
    s = h @ a[:f_out]
    d = h @ a[f_out:]
    e = s + jnp.swapaxes(d, -1, -2)
    e = jnp.where(e > 0, e, alpha * e)
    e = jnp.where(adj > 0, e, -9.0e15)
    attn = jax.nn.softmax(e, axis=-1)
    hp = attn @ h
    if apply_elu:
        hp = jnp.where(hp > 0, hp, jnp.exp(hp) - 1.0)
    return hp


def gat_forward_ref_f32(x, adj, params, *, alpha):
    heads = [_gat_layer_ref(x, adj, W, a, alpha, True) for (W, a) in params["heads"]]
    xc = jnp.concatenate(heads, axis=-1)
    Wo, ao = params["out"]
    out = _gat_layer_ref(xc, adj, Wo, ao, alpha, False)
    out = jnp.where(out > 0, out, jnp.exp(out) - 1.0)
    return out.mean(axis=-2)


def _fused_layer_ref_bf16(x_bf16, bias_bf16, w_aug_bf16, heads, hid, alpha,
                          apply_elu):
    d_h = heads * hid
    hz = jnp.einsum('bnf,fd->bnd', x_bf16, w_aug_bf16,
                    preferred_element_type=jnp.float32)
    h_all, e_src, e_dst = hz[..., :d_h], hz[..., d_h:d_h + heads], hz[..., d_h + heads:]
    bias = bias_bf16.astype(jnp.float32)
    outs = []
    for k in range(heads):
        e = e_src[..., k:k + 1] + jnp.swapaxes(e_dst[..., k:k + 1], -1, -2)
        e = jnp.where(e > 0, e, alpha * e) + bias
        attn = jax.nn.softmax(e, axis=-1)
        hp = jnp.einsum('bij,bjd->bid', attn.astype(jnp.bfloat16),
                        h_all[..., k * hid:(k + 1) * hid].astype(jnp.bfloat16),
                        preferred_element_type=jnp.float32)
        if apply_elu:
            hp = jnp.where(hp > 0, hp, jnp.exp(hp) - 1.0)
        outs.append(hp)
    return jnp.concatenate(outs, axis=-1)


def gat_forward_ref_bf16(x, adj, params, *, alpha):
    bias = jnp.where(adj > 0, 0.0, -9.0e15).astype(jnp.bfloat16)
    heads = len(params["heads"])
    hid = params["heads"][0][0].shape[1]
    out_dim = params["out"][0].shape[1]
    h1 = _fused_layer_ref_bf16(x.astype(jnp.bfloat16), bias,
                               _build_w_aug(params["heads"]),
                               heads, hid, alpha, True).astype(jnp.bfloat16)
    h2 = _fused_layer_ref_bf16(h1, bias, _build_w_aug([params["out"]]),
                               1, out_dim, alpha, True)
    return h2.mean(axis=-2)


# ---------------------------------------------------------------------------
# Deterministic parameter init (xavier_uniform, gain=1.414).
# ---------------------------------------------------------------------------
def _xavier_uniform(key, shape, gain=1.414):
    fan_out, fan_in = shape[0], shape[1]
    bound = gain * (6.0 / (fan_in + fan_out)) ** 0.5
    return jax.random.uniform(key, shape, jnp.float32, -bound, bound)


def init_gat_params(key, inp_dim, hid_dim, out_dim, heads_num):
    keys = jax.random.split(key, 2 * heads_num + 2)
    heads = []
    for i in range(heads_num):
        W = _xavier_uniform(keys[2 * i], (inp_dim, hid_dim))
        a = _xavier_uniform(keys[2 * i + 1], (2 * hid_dim, 1))
        heads.append((W, a))
    Wo = _xavier_uniform(keys[-2], (hid_dim * heads_num, out_dim))
    ao = _xavier_uniform(keys[-1], (2 * out_dim, 1))
    return {"heads": heads, "out": (Wo, ao)}


if __name__ == "__main__":
    B, N = 2, 8
    inp_dim, hid_dim, out_dim, heads_num = 16, 32, 16, 3
    alpha = 0.01

    key = jax.random.PRNGKey(0)
    k_x, k_adj, k_p = jax.random.split(key, 3)

    x = jax.random.normal(k_x, (B, N, inp_dim), jnp.float32)
    # random sparse adjacency with self-loops
    adj = (jax.random.uniform(k_adj, (B, N, N)) > 0.5).astype(jnp.int32)
    adj = jnp.maximum(adj, jnp.eye(N, dtype=jnp.int32)[None, :, :])

    params = init_gat_params(k_p, inp_dim, hid_dim, out_dim, heads_num)

    out = jax.block_until_ready(gat_forward(x, adj, params, alpha=alpha))
    assert out.shape == (B, out_dim), out.shape

    # 1) cast-matched reference: tight check of kernel correctness.
    ref_bf16 = gat_forward_ref_bf16(x, adj, params, alpha=alpha)
    assert jnp.allclose(out, ref_bf16, atol=1e-2, rtol=1e-2), \
        float(jnp.abs(out - ref_bf16).max())

    # 2) exact f32 torch-semantics reference: looser (bf16 MXU inputs).
    ref_f32 = gat_forward_ref_f32(x, adj, params, alpha=alpha)
    assert jnp.allclose(out, ref_f32, atol=1e-1, rtol=1e-1), \
        float(jnp.abs(out - ref_f32).max())

    print("KERNEL_OK")
</pallas_src>

<mosaic_0001>
module attributes {stable_mosaic.version = 11 : i64} {
  func.func @_gat_fused_kernel(%arg0: i32, %arg1: memref<1x8x16xbf16, #tpu.memory_space<vmem>>, %arg2: memref<1x8x8xbf16, #tpu.memory_space<vmem>>, %arg3: memref<16x102xbf16, #tpu.memory_space<vmem>>, %arg4: memref<1x8x96xbf16, #tpu.memory_space<vmem>>) attributes {dimension_semantics = [#tpu.dimension_semantics<parallel>], iteration_bounds = array<i64: 2>, scalar_prefetch = 0 : i64, scratch_operands = 0 : i64, tpu.core_type = #tpu.core_type<tc>, window_params = [{transform_indices = @transform_0, window_bounds = array<i64: 1, 8, 16>}, {transform_indices = @transform_1, window_bounds = array<i64: 1, 8, 8>}, {pipeline_mode = #tpu.pipeline_mode<synchronous>, transform_indices = @transform_2, window_bounds = array<i64: 16, 102>}, {transform_indices = @transform_3, window_bounds = array<i64: 1, 8, 96>}]} {
    %c0 = arith.constant 0 : index
    %c0_0 = arith.constant 0 : index
    %c0_1 = arith.constant 0 : index
    %0 = vector.load %arg1[%c0, %c0_0, %c0_1] : memref<1x8x16xbf16, #tpu.memory_space<vmem>>, vector<1x8x16xbf16>
    %c0_2 = arith.constant 0 : index
    %c0_3 = arith.constant 0 : index
    %c0_4 = arith.constant 0 : index
    %1 = vector.load %arg2[%c0_2, %c0_3, %c0_4] : memref<1x8x8xbf16, #tpu.memory_space<vmem>>, vector<1x8x8xbf16>
    %2 = arith.extf %1 : vector<1x8x8xbf16> to vector<1x8x8xf32>
    %c0_5 = arith.constant 0 : index
    %c0_6 = arith.constant 0 : index
    %3 = vector.load %arg3[%c0_5, %c0_6] : memref<16x102xbf16, #tpu.memory_space<vmem>>, vector<16x102xbf16>
    %4 = vector.shape_cast %0 : vector<1x8x16xbf16> to vector<8x16xbf16>
    %cst = arith.constant dense<0.000000e+00> : vector<8x102xf32>
    %5 = tpu.matmul %4, %3, %cst {dimension_numbers = #tpu.dot_dimension_numbers<[1], [0], [0], [1], [0, 0, 1, 1], [], []>} : vector<8x16xbf16>, vector<16x102xbf16>, vector<8x102xf32> -> vector<8x102xf32>
    %6 = vector.shape_cast %5 : vector<8x102xf32> to vector<1x8x102xf32>
    %7 = vector.extract_strided_slice %6 {offsets = [0, 0, 0], sizes = [1, 8, 96], strides = [1, 1, 1]} : vector<1x8x102xf32> to vector<1x8x96xf32>
    %8 = vector.extract_strided_slice %6 {offsets = [0, 0, 96], sizes = [1, 8, 3], strides = [1, 1, 1]} : vector<1x8x102xf32> to vector<1x8x3xf32>
    %9 = vector.extract_strided_slice %6 {offsets = [0, 0, 99], sizes = [1, 8, 3], strides = [1, 1, 1]} : vector<1x8x102xf32> to vector<1x8x3xf32>
    %10 = vector.extract_strided_slice %8 {offsets = [0, 0, 0], sizes = [1, 8, 1], strides = [1, 1, 1]} : vector<1x8x3xf32> to vector<1x8x1xf32>
    %11 = vector.extract_strided_slice %9 {offsets = [0, 0, 0], sizes = [1, 8, 1], strides = [1, 1, 1]} : vector<1x8x3xf32> to vector<1x8x1xf32>
    %12 = tpu.transpose %11, [0, 2, 1] : vector<1x8x1xf32> -> vector<1x1x8xf32>
    %13 = vector.broadcast %10 : vector<1x8x1xf32> to vector<1x8x8xf32>
    %14 = vector.broadcast %12 : vector<1x1x8xf32> to vector<1x8x8xf32>
    %15 = arith.addf %13, %14 : vector<1x8x8xf32>
    %cst_7 = arith.constant 0.000000e+00 : f32
    %16 = vector.broadcast %cst_7 : f32 to vector<1x8x8xf32>
    %17 = arith.cmpf ogt, %15, %16 : vector<1x8x8xf32>
    %cst_8 = arith.constant 0.00999999977 : f32
    %18 = vector.broadcast %cst_8 : f32 to vector<1x8x8xf32>
    %19 = arith.mulf %18, %15 : vector<1x8x8xf32>
    %20 = arith.select %17, %15, %19 : vector<1x8x8xi1>, vector<1x8x8xf32>
    %21 = arith.addf %20, %2 : vector<1x8x8xf32>
    %cst_9 = arith.constant dense<0xFF800000> : vector<1x8xf32>
    %22 = vector.multi_reduction <maximumf>, %21, %cst_9 [2] : vector<1x8x8xf32> to vector<1x8xf32>
    %23 = vector.shape_cast %22 : vector<1x8xf32> to vector<1x8x1xf32>
    %24 = vector.broadcast %23 : vector<1x8x1xf32> to vector<1x8x8xf32>
    %25 = arith.subf %21, %24 : vector<1x8x8xf32>
    %26 = math.exp %25 : vector<1x8x8xf32>
    %cst_10 = arith.constant dense<0.000000e+00> : vector<1x8xf32>
    %27 = vector.multi_reduction <add>, %26, %cst_10 [2] : vector<1x8x8xf32> to vector<1x8xf32>
    %28 = vector.shape_cast %27 : vector<1x8xf32> to vector<1x8x1xf32>
    %29 = tpu.reciprocal %28 {approx = true} : vector<1x8x1xf32> -> vector<1x8x1xf32>
    %30 = vector.broadcast %29 : vector<1x8x1xf32> to vector<1x8x8xf32>
    %31 = arith.mulf %26, %30 : vector<1x8x8xf32>
    %32 = vector.extract_strided_slice %7 {offsets = [0, 0, 0], sizes = [1, 8, 32], strides = [1, 1, 1]} : vector<1x8x96xf32> to vector<1x8x32xf32>
    %33 = arith.truncf %31 : vector<1x8x8xf32> to vector<1x8x8xbf16>
    %34 = arith.truncf %32 : vector<1x8x32xf32> to vector<1x8x32xbf16>
    "tpu.trace_start"() <{level = 10 : i32, message = "bij,bjd->bid"}> : () -> ()
    %cst_11 = arith.constant dense<0.000000e+00> : vector<1x8x32xf32>
    %35 = tpu.matmul %33, %34, %cst_11 {dimension_numbers = #tpu.dot_dimension_numbers<[2], [1], [1], [2], [0, 0, 0, 1, 1, 2], [0], [0]>} : vector<1x8x8xbf16>, vector<1x8x32xbf16>, vector<1x8x32xf32> -> vector<1x8x32xf32>
    %cst_12 = arith.constant 0.000000e+00 : f32
    "tpu.trace_stop"() : () -> ()
    %36 = vector.broadcast %cst_12 : f32 to vector<1x8x32xf32>
    %37 = arith.cmpf ogt, %35, %36 : vector<1x8x32xf32>
    %38 = math.exp %35 : vector<1x8x32xf32>
    %cst_13 = arith.constant 1.000000e+00 : f32
    %39 = vector.broadcast %cst_13 : f32 to vector<1x8x32xf32>
    %40 = arith.subf %38, %39 : vector<1x8x32xf32>
    %41 = arith.select %37, %35, %40 : vector<1x8x32xi1>, vector<1x8x32xf32>
    %42 = vector.extract_strided_slice %8 {offsets = [0, 0, 1], sizes = [1, 8, 1], strides = [1, 1, 1]} : vector<1x8x3xf32> to vector<1x8x1xf32>
    %43 = vector.extract_strided_slice %9 {offsets = [0, 0, 1], sizes = [1, 8, 1], strides = [1, 1, 1]} : vector<1x8x3xf32> to vector<1x8x1xf32>
    %44 = tpu.transpose %43, [0, 2, 1] : vector<1x8x1xf32> -> vector<1x1x8xf32>
    %45 = vector.broadcast %42 : vector<1x8x1xf32> to vector<1x8x8xf32>
    %46 = vector.broadcast %44 : vector<1x1x8xf32> to vector<1x8x8xf32>
    %47 = arith.addf %45, %46 : vector<1x8x8xf32>
    %cst_14 = arith.constant 0.000000e+00 : f32
    %48 = vector.broadcast %cst_14 : f32 to vector<1x8x8xf32>
    %49 = arith.cmpf ogt, %47, %48 : vector<1x8x8xf32>
    %cst_15 = arith.constant 0.00999999977 : f32
    %50 = vector.broadcast %cst_15 : f32 to vector<1x8x8xf32>
    %51 = arith.mulf %50, %47 : vector<1x8x8xf32>
    %52 = arith.select %49, %47, %51 : vector<1x8x8xi1>, vector<1x8x8xf32>
    %53 = arith.addf %52, %2 : vector<1x8x8xf32>
    %cst_16 = arith.constant dense<0xFF800000> : vector<1x8xf32>
    %54 = vector.multi_reduction <maximumf>, %53, %cst_16 [2] : vector<1x8x8xf32> to vector<1x8xf32>
    %55 = vector.shape_cast %54 : vector<1x8xf32> to vector<1x8x1xf32>
    %56 = vector.broadcast %55 : vector<1x8x1xf32> to vector<1x8x8xf32>
    %57 = arith.subf %53, %56 : vector<1x8x8xf32>
    %58 = math.exp %57 : vector<1x8x8xf32>
    %cst_17 = arith.constant dense<0.000000e+00> : vector<1x8xf32>
    %59 = vector.multi_reduction <add>, %58, %cst_17 [2] : vector<1x8x8xf32> to vector<1x8xf32>
    %60 = vector.shape_cast %59 : vector<1x8xf32> to vector<1x8x1xf32>
    %61 = tpu.reciprocal %60 {approx = true} : vector<1x8x1xf32> -> vector<1x8x1xf32>
    %62 = vector.broadcast %61 : vector<1x8x1xf32> to vector<1x8x8xf32>
    %63 = arith.mulf %58, %62 : vector<1x8x8xf32>
    %64 = vector.extract_strided_slice %7 {offsets = [0, 0, 32], sizes = [1, 8, 32], strides = [1, 1, 1]} : vector<1x8x96xf32> to vector<1x8x32xf32>
    %65 = arith.truncf %63 : vector<1x8x8xf32> to vector<1x8x8xbf16>
    %66 = arith.truncf %64 : vector<1x8x32xf32> to vector<1x8x32xbf16>
    "tpu.trace_start"() <{level = 10 : i32, message = "bij,bjd->bid"}> : () -> ()
    %cst_18 = arith.constant dense<0.000000e+00> : vector<1x8x32xf32>
    %67 = tpu.matmul %65, %66, %cst_18 {dimension_numbers = #tpu.dot_dimension_numbers<[2], [1], [1], [2], [0, 0, 0, 1, 1, 2], [0], [0]>} : vector<1x8x8xbf16>, vector<1x8x32xbf16>, vector<1x8x32xf32> -> vector<1x8x32xf32>
    %cst_19 = arith.constant 0.000000e+00 : f32
    "tpu.trace_stop"() : () -> ()
    %68 = vector.broadcast %cst_19 : f32 to vector<1x8x32xf32>
    %69 = arith.cmpf ogt, %67, %68 : vector<1x8x32xf32>
    %70 = math.exp %67 : vector<1x8x32xf32>
    %cst_20 = arith.constant 1.000000e+00 : f32
    %71 = vector.broadcast %cst_20 : f32 to vector<1x8x32xf32>
    %72 = arith.subf %70, %71 : vector<1x8x32xf32>
    %73 = arith.select %69, %67, %72 : vector<1x8x32xi1>, vector<1x8x32xf32>
    %74 = vector.extract_strided_slice %8 {offsets = [0, 0, 2], sizes = [1, 8, 1], strides = [1, 1, 1]} : vector<1x8x3xf32> to vector<1x8x1xf32>
    %75 = vector.extract_strided_slice %9 {offsets = [0, 0, 2], sizes = [1, 8, 1], strides = [1, 1, 1]} : vector<1x8x3xf32> to vector<1x8x1xf32>
    %76 = tpu.transpose %75, [0, 2, 1] : vector<1x8x1xf32> -> vector<1x1x8xf32>
    %77 = vector.broadcast %74 : vector<1x8x1xf32> to vector<1x8x8xf32>
    %78 = vector.broadcast %76 : vector<1x1x8xf32> to vector<1x8x8xf32>
    %79 = arith.addf %77, %78 : vector<1x8x8xf32>
    %cst_21 = arith.constant 0.000000e+00 : f32
    %80 = vector.broadcast %cst_21 : f32 to vector<1x8x8xf32>
    %81 = arith.cmpf ogt, %79, %80 : vector<1x8x8xf32>
    %cst_22 = arith.constant 0.00999999977 : f32
    %82 = vector.broadcast %cst_22 : f32 to vector<1x8x8xf32>
    %83 = arith.mulf %82, %79 : vector<1x8x8xf32>
    %84 = arith.select %81, %79, %83 : vector<1x8x8xi1>, vector<1x8x8xf32>
    %85 = arith.addf %84, %2 : vector<1x8x8xf32>
    %cst_23 = arith.constant dense<0xFF800000> : vector<1x8xf32>
    %86 = vector.multi_reduction <maximumf>, %85, %cst_23 [2] : vector<1x8x8xf32> to vector<1x8xf32>
    %87 = vector.shape_cast %86 : vector<1x8xf32> to vector<1x8x1xf32>
    %88 = vector.broadcast %87 : vector<1x8x1xf32> to vector<1x8x8xf32>
    %89 = arith.subf %85, %88 : vector<1x8x8xf32>
    %90 = math.exp %89 : vector<1x8x8xf32>
    %cst_24 = arith.constant dense<0.000000e+00> : vector<1x8xf32>
    %91 = vector.multi_reduction <add>, %90, %cst_24 [2] : vector<1x8x8xf32> to vector<1x8xf32>
    %92 = vector.shape_cast %91 : vector<1x8xf32> to vector<1x8x1xf32>
    %93 = tpu.reciprocal %92 {approx = true} : vector<1x8x1xf32> -> vector<1x8x1xf32>
    %94 = vector.broadcast %93 : vector<1x8x1xf32> to vector<1x8x8xf32>
    %95 = arith.mulf %90, %94 : vector<1x8x8xf32>
    %96 = vector.extract_strided_slice %7 {offsets = [0, 0, 64], sizes = [1, 8, 32], strides = [1, 1, 1]} : vector<1x8x96xf32> to vector<1x8x32xf32>
    %97 = arith.truncf %95 : vector<1x8x8xf32> to vector<1x8x8xbf16>
    %98 = arith.truncf %96 : vector<1x8x32xf32> to vector<1x8x32xbf16>
    "tpu.trace_start"() <{level = 10 : i32, message = "bij,bjd->bid"}> : () -> ()
    %cst_25 = arith.constant dense<0.000000e+00> : vector<1x8x32xf32>
    %99 = tpu.matmul %97, %98, %cst_25 {dimension_numbers = #tpu.dot_dimension_numbers<[2], [1], [1], [2], [0, 0, 0, 1, 1, 2], [0], [0]>} : vector<1x8x8xbf16>, vector<1x8x32xbf16>, vector<1x8x32xf32> -> vector<1x8x32xf32>
    %cst_26 = arith.constant 0.000000e+00 : f32
    "tpu.trace_stop"() : () -> ()
    %100 = vector.broadcast %cst_26 : f32 to vector<1x8x32xf32>
    %101 = arith.cmpf ogt, %99, %100 : vector<1x8x32xf32>
    %102 = math.exp %99 : vector<1x8x32xf32>
    %cst_27 = arith.constant 1.000000e+00 : f32
    %103 = vector.broadcast %cst_27 : f32 to vector<1x8x32xf32>
    %104 = arith.subf %102, %103 : vector<1x8x32xf32>
    %105 = arith.select %101, %99, %104 : vector<1x8x32xi1>, vector<1x8x32xf32>
    %106 = tpu.concatenate %41, %73, %105 in 2 : vector<1x8x32xf32>, vector<1x8x32xf32>, vector<1x8x32xf32> -> vector<1x8x96xf32>
    %107 = arith.truncf %106 : vector<1x8x96xf32> to vector<1x8x96xbf16>
    %c0_28 = arith.constant 0 : index
    %c0_29 = arith.constant 0 : index
    %c0_30 = arith.constant 0 : index
    %108 = vector.load %arg4[%c0_28, %c0_29, %c0_30] : memref<1x8x96xbf16, #tpu.memory_space<vmem>>, vector<1x8x96xbf16>
    tpu.vector_store %arg4[%c0_28, %c0_29, %c0_30], %107 {strides = array<i32>} : memref<1x8x96xbf16, #tpu.memory_space<vmem>>, vector<1x8x96xbf16>,
    return
  }
  func.func @transform_0(%arg0: i32) -> (i32, i32, i32) {
    %c0_i32 = arith.constant 0 : i32
    %c0_i32_0 = arith.constant 0 : i32
    %c0_i32_1 = arith.constant 0 : i32
    return %arg0, %c0_i32, %c0_i32_0 : i32, i32, i32
  }
  func.func @transform_1(%arg0: i32) -> (i32, i32, i32) {
    %c0_i32 = arith.constant 0 : i32
    %c0_i32_0 = arith.constant 0 : i32
    %c0_i32_1 = arith.constant 0 : i32
    return %arg0, %c0_i32, %c0_i32_0 : i32, i32, i32
  }
  func.func @transform_2(%arg0: i32) -> (i32, i32) {
    %c0_i32 = arith.constant 0 : i32
    %c0_i32_0 = arith.constant 0 : i32
    %c0_i32_1 = arith.constant 0 : i32
    return %c0_i32, %c0_i32_0 : i32, i32
  }
  func.func @transform_3(%arg0: i32) -> (i32, i32, i32) {
    %c0_i32 = arith.constant 0 : i32
    %c0_i32_0 = arith.constant 0 : i32
    %c0_i32_1 = arith.constant 0 : i32
    return %arg0, %c0_i32, %c0_i32_0 : i32, i32, i32
  }
}

</mosaic_0001>

<bundles_post_ra>
// kernel: tpu_custom_call.1
= control target key start
LH: loop header
LB: loop body
LE: loop exit
PB: predicated region body
PF: predicated region fallthrough
CT: control target
= control target key end

     0   :  { %8 = vsyncpa [#allocation3], 0  ;;  %s1345_s0 = inlined_call_operand.hbm [shape: bf16[2,8,16], index: 0, kind: input, shape index: {}]   ;;  %s1346_s1 = inlined_call_operand.hbm [shape: bf16[2,8,8], index: 1, kind: input, shape index: {}]   ;;  %s1347_s2 = inlined_call_operand.hbm [shape: bf16[16,102], index: 2, kind: input, shape index: {}]   ;;  %s1348_s3 = inlined_call_operand.hbm [shape: bf16[2,8,96], index: 3, kind: output, shape index: {}]  }
   0x1   :  { %10 = vsyncpa [#allocation3 + $0x1], 0 }
   0x2   :  { %11 = vsyncpa [#allocation6], 0 }
   0x3   :  { %13 = vsyncpa [#allocation6 + $0x1], 0 }
   0x4   :  { %14 = vsyncpa [#allocation4], 0 }
   0x5   :  { %16 = vsyncpa [#allocation4 + $0x1], 0  ;;  %s1114_s12 = smov 0   ;;  %s1116_s13 = smov 0  }
   0x6   :  { %s1118_s14 = smov 0   ;;  %s1120_s15 = smov 0  }
   0x7 LB: > { %s1135_s16 = sadd.s32 4294967295, %s1075_s15   ;;  %s766_s17 = sadd.s32 4294967294, %s1075_s15   ;;  %s1075_s15 = sphi %s1120_s15, %s1370_s15   ;;  %s1071_s14 = sphi %s1118_s14, %s1369_s14   ;;  %s1067_s13 = sphi %s1116_s13, %s1368_s13   ;;  %s1063_s12 = sphi %s1114_s12, %s1367_s12  }
   0x8   : > { %p42_p0 = scmp.ne.s32.totalorder %s1067_s13, %s1063_s12  ;;  %p1349_p1 = scmp.eq.s32.totalorder %s1135_s16, 0 }
   0x9   : > { %p119_p3 = scmp.eq.s32.totalorder %s766_s17, 1  ;;  %p767_p5 = scmp.ge.s32.totalorder %s1075_s15, 1 }
   0xa   : > { %p1144_p4 = por %p1349_p1, %p42_p0  ;;  %p126_p7 = scmp.lt.s32.totalorder %s1075_s15, 3 }
   0xb   : > { %p1149_p6 = por %p119_p3, %p42_p0  ;;  %s1077_s21 = smov [#allocation7]  }
   0xc   : > { %s1353_s18 = scalar_select %p1144_p4, 1, 0 }
   0xd   : > { %s1354_s19 = scalar_select %p1149_p6, 1, 0 }
   0xe   : > { %p1154_p8 = pnand %p767_p5, %p126_p7  ;;  %s138_s22 = sshll.u32 %s1077_s21, 4  ;;  %s139_s22 = int_to_ptr.vmem [resolvable:$true] %s138_s22 }
   0xf   : > { %s1168_s24 = sadd.s32 1, %s1075_s15   ;;  %s29_s25 = sadd.s32 1, %s1071_s14 }
  0x10   : > { %s1355_s20 = scalar_select %p1154_p8, 1, 0 }
  0x11   : > { %p833_p9 = pneg %p1154_p8  ;;  %s26_s26 = ssub.s32 %s1075_s15, %s1168_s24 }
  0x12   : > { %s932_s27 = scalar_lea.vmem %s139_s22, 128  ;;  %p940_p5 = scmp.lt.s32.totalorder %s139_s22, %s139_s22 }
  0x13   : > { %p1163_p11 = pnand %p833_p9, %p1349_p1  ;;  %p933_p13 = scmp.ne.s32.totalorder %s139_s22, %s932_s27 }
  0x14   : > { %p941_p7 = scmp.lt.s32.totalorder %s932_s27, %s932_s27 }
  0x15   : > { %p923_p12 = pneg %p1163_p11 }
  0x16   : > { %p942_p10 = por %p941_p7, %p940_p5 }
  0x17   : > { %p935_p0 = pnand %p933_p13, %p923_p12 }
  0x19   : > { %p936_p3 = pneg %p935_p0 }
  0x1b   : > { %p943_p2 = pnand %p942_p10, %p936_p3 }
  0x1d   : > { %946 = shalt.err (!%p943_p2)
}
  0x1e   : > { %s1078_s28 = smov 64   ;;  %s1079_s29 = smov 4  }
  0x1f   : > { %836 = dma.hbm_to_vmem [thread:$0]  (!%p1163_p11), %s1347_s2, 128, %s139_s22, [#allocation6], %s1078_s28, %s1078_s28, %s1079_s29  }
  0x20   : > { %p27_p9 = scmp.eq.s32.totalorder %s26_s26, 0  ;;  %p36_p12 = scmp.ne.s32.totalorder %s1071_s14, %s1067_s13 }
  0x21   : > { %p37_p10 = scmp.eq.s32.totalorder %s1075_s15, 0  ;;  %p849_p2 = scmp.lt.s32.totalorder %s1075_s15, 2 }
  0x22   : > { %s1185_s5 = scalar_select %p27_p9, %s1071_s14, %s29_s25  }
  0x23   : > { %p38_p13 = por %p37_p10, %p36_p12  ;;  %p1357_p0 = scmp.eq.s32.totalorder %s1135_s16, 1 }
  0x24   : > { %s152_s7 = sand.u32 1, %s1071_s14   ;;  %s771_s8 = sshll.u32 %s1075_s15, 6 }
  0x25   : > { %p1189_p3 = por %p1357_p0, %p36_p12  ;;  %s1195_s9 = sshll.u32 %s152_s7, 2 }
  0x26   : > { %s1200_s17 = scalar_lea.hbm %s1345_s0, %s771_s8  ;;  %s156_s21 = scalar_lea.vmem [#allocation2], %s1195_s9 }
  0x27   : > { %s1358_s6 = scalar_select %p1189_p3, 1, 0 }
  0x28   : > { %s163_s22 = sshll.u32 %s156_s21, 4  ;;  %p1203_p11 = pnand %p849_p2, %p38_p13  ;;  %s164_s22 = int_to_ptr.vmem [resolvable:$true] %s163_s22 }
  0x29   : > { %s1210_s27 = scalar_lea.hbm %s1346_s1, %s771_s8  ;;  %s153_s28 = scalar_lea.sflag [#allocation3], %s152_s7 }
  0x2a   : > { %s947_s29 = scalar_lea.hbm %s1200_s17, 64  ;;  %p949_p7 = pneg %p1203_p11 }
  0x2b   : > { %p948_p5 = scmp.ne.s32.totalorder %s1200_s17, %s947_s29  ;;  %s952_s10 = scalar_lea.hbm %s1345_s0, 128 }
  0x2c   : > { %p953_p10 = scmp.lt.s32.totalorder %s1200_s17, %s1345_s0  ;;  %p954_p2 = scmp.lt.s32.totalorder %s952_s10, %s947_s29 }
  0x2d   : > { %p950_p9 = pnand %p949_p7, %p948_p5 }
  0x2e   : > { %p955_p13 = por %p954_p2, %p953_p10 }
  0x2f   : > { %p951_p12 = pneg %p950_p9 }
  0x31   : > { %p956_p0 = pnand %p955_p13, %p951_p12 }
  0x33   : > { %959 = shalt.err (!%p956_p0)
}
  0x34   : > { %s960_s7 = scalar_lea.vmem %s164_s22, 64  ;;  %s1080_s8 = smov [#allocation2]  }
  0x35   : > { %p961_p1 = scmp.ne.s32.totalorder %s164_s22, %s960_s7  ;;  %s965_s25 = sshll.u32 %s1080_s8, 4  ;;  %s966_s25 = int_to_ptr.vmem [resolvable:$false] %s965_s25 }
  0x36   : > { %s967_s26 = scalar_lea.vmem %s966_s25, 128  ;;  %p968_p9 = scmp.lt.s32.totalorder %s164_s22, %s966_s25 }
  0x37   : > { %p963_p6 = pnand %p961_p1, %p949_p7  ;;  %p969_p3 = scmp.lt.s32.totalorder %s967_s26, %s960_s7 }
  0x39   : > { %p964_p5 = pneg %p963_p6  ;;  %p970_p4 = por %p969_p3, %p968_p9 }
  0x3b   : > { %p971_p8 = pnand %p970_p4, %p964_p5 }
  0x3d   : > { %974 = shalt.err (!%p971_p8)
}
  0x3e   : > { %840 = dma.hbm_to_vmem [thread:$0]  (!%p1203_p11), %s1200_s17, 64, %s164_s22, %s153_s28  }
  0x3f   : > { %s170_s29 = sand.u32 1, %s1075_s15   ;;  %s174_s30 = scalar_lea.vmem [#allocation5], %s1195_s9 }
  0x40   : > { %s181_s4 = sshll.u32 %s174_s30, 4  ;;  %s171_s10 = scalar_lea.sflag [#allocation6], %s170_s29  ;;  %s182_s4 = int_to_ptr.vmem [resolvable:$true] %s181_s4 }
  0x41   : > { %s975_s11 = scalar_lea.hbm %s1210_s27, 64  ;;  %s980_s8 = scalar_lea.hbm %s1346_s1, 128 }
  0x42   : > { %p976_p1 = scmp.ne.s32.totalorder %s1210_s27, %s975_s11  ;;  %p981_p8 = scmp.lt.s32.totalorder %s1210_s27, %s1346_s1 }
  0x43   : > { %p982_p3 = scmp.lt.s32.totalorder %s980_s8, %s975_s11 }
  0x44   : > { %p978_p4 = pnand %p976_p1, %p949_p7 }
  0x45   : > { %p983_p12 = por %p982_p3, %p981_p8 }
  0x46   : > { %p979_p6 = pneg %p978_p4 }
  0x48   : > { %p984_p10 = pnand %p983_p12, %p979_p6 }
  0x4a   : > { %987 = shalt.err (!%p984_p10)
}
  0x4b   : > { %s988_s9 = scalar_lea.vmem %s182_s4, 64  ;;  %s1081_s17 = smov [#allocation5]  }
  0x4c   : > { %p989_p2 = scmp.ne.s32.totalorder %s182_s4, %s988_s9  ;;  %s993_s22 = sshll.u32 %s1081_s17, 4  ;;  %s994_s22 = int_to_ptr.vmem [resolvable:$false] %s993_s22 }
  0x4d   : > { %s995_s28 = scalar_lea.vmem %s994_s22, 128  ;;  %p996_p5 = scmp.lt.s32.totalorder %s182_s4, %s994_s22 }
  0x4e   : > { %p991_p13 = pnand %p989_p2, %p949_p7  ;;  %p997_p9 = scmp.lt.s32.totalorder %s995_s28, %s988_s9 }
  0x50   : > { %p992_p0 = pneg %p991_p13  ;;  %p998_p1 = por %p997_p9, %p996_p5 }
  0x52   : > { %p999_p4 = pnand %p998_p1, %p992_p0 }
  0x54   : > { %1002 = shalt.err (!%p999_p4)
}
  0x55   : > { %843 = dma.hbm_to_vmem [thread:$0]  (!%p1203_p11), %s1210_s27, 64, %s182_s4, %s171_s10  }
  0x56   : > { %p1360_p6 = scmp.ne.s32.totalorder %s1355_s20, 0 }
  0x57   : > { %s1255_s29 = sand.u32 (!%p1360_p6), 1, %s1067_s13   ;;  %p1361_p7 = scmp.ne.s32.totalorder (!%p1360_p6), %s1353_s18, 0 }
  0x58   : > { %190 = sbr.rel (%p1360_p6) target bundleno = 1213 (0x4bd), region = 32  ;;  %s1258_s30 = sshll.u32 (!%p1360_p6), %s1255_s29, 2 }
  0x59   : > { %s193_s11 = scalar_lea.sflag (!%p1360_p6), [#allocation3], %s1255_s29  ;;  %s196_s21 = scalar_lea.vmem (!%p1360_p6), [#allocation2], %s1258_s30 }
  0x5d   : > { %1046 = dma.done.wait (%p1361_p7), %s193_s11, 64  }
  0x5e   : > { %1048 = vsyncadd (%p1361_p7), %s193_s11, 4294967232  ;;  %s201_s20 = sand.u32 1, %s1135_s16   ;;  %s205_s27 = scalar_lea.vmem [#allocation5], %s1258_s30 }
  0x5f   : > { %s202_s23 = scalar_lea.sflag [#allocation6], %s201_s20 }
  0x60   : > { %1050 = dma.done.wait (%p1361_p7), %s202_s23, 64  }
  0x61   : > { %1052 = vsyncadd (%p1361_p7), %s202_s23, 4294967232  ;;  %p1362_p11 = scmp.eq.s32.totalorder %s1135_s16, 0 }
  0x63   : > { %1054 = dma.done.wait (%p1362_p11), [#allocation6], 128   ;;  %p1363_p8 = pmov %p1362_p11 }
  0x64   : > { %v1082_v0 = vmov 0.0   ;;  %vm1083_vm0 = vmmov 0   ;;  %v902_v1 = vld [vmem:[#allocation7] sm:$0xff]   ;;  %v238_v2 = vld [vmem:[%s196_s21] sm:$0xf]  ;;  %vm249_vm1 = vcmask 130048   ;;  %v333_v15 = vlaneseq }
  0x65   : > { %1056 = vsyncadd (%p1363_p8), [#allocation6], 4294967168  ;;  %799 = vmatprep.subr.bf16.mxu0 %v1082_v0  ;;  %801 = vmatprep.mubr.msk.bf16.mxu0 %vm1083_vm0, %v1082_v0  ;;  %v1084_v3 = vmov 96   ;;  %v1085_v4 = vmov 97   ;;  %vm359_vm2 = vcmask 1043456   ;;  %s1086_s18 = smov 27  }
  0x66   : > { %805 = vmatprep.subr.bf16.mxu1 %v1082_v0  ;;  %807 = vmatprep.mubr.msk.bf16.mxu1 %vm1083_vm0, %v1082_v0  ;;  %s1087_s4 = smov 29   ;;  %s1088_s10 = smov 28   ;;  %v1089_v11 = vmov 98   ;;  %v334_v17 = vshrl.u32 %v333_v15, 7  ;;  %v239_v23 = vld [vmem:[%s205_s27] sm:$0xf] }
  0x67   : > { %800 = vmatpush3.bf16.msra.mxu0 %v902_v1  ;;  %898 = vset.pattern.permute.xlu1 %v1084_v3  ;;  %v240_v26 = vunpack.c.l.bf16 %v239_v23  ;;  %vm342_vm4 = vcmask 64512   ;;  %s1090_s7 = smov 96   ;;  %s1091_s8 = smov 64   ;;  %vm643_vm9 = vcmask 261120   ;;  %vm645_vm11 = vcmask 523264  }
  0x68   : > { %811 = vmatprep.subr.bf16.mxu0 %v1082_v0  ;;  %899 = vset.pattern.permute.xlu0 %v1085_v4  ;;  %v335_v19 = vsub.s32 0, %v334_v17  ;;  %s1092_s25 = smov 32   ;;  %s788_s26 = sshll.u32 %s1135_s16, 6  ;;  %vm648_vm12 = vcmask 781312  }
  0x69   : > { %s236_s9 = scalar_lea.vmem [#allocation8], %s1258_s30  ;;  %s662_s11 = scalar_lea.hbm %s1348_s3, %s788_s26 }
  0x6a   : > { %802 = vmatmul.mubr.msk.bf16.vlgmr.msra.gmra.mxu0 %vm249_vm1, %v238_v2  ;;  %s664_s17 = sshll.u32 %s236_s9, 4  ;;  %s651_s21 = scalar_lea.sflag [#allocation4], %s1255_s29  ;;  %s665_s17 = int_to_ptr.vmem [resolvable:$true] %s664_s17 }
  0x6b   : > { %813 = vmatprep.mubr.msk.bf16.mxu0 %vm1083_vm0, %v1082_v0  ;;  %s1003_s20 = scalar_lea.vmem %s665_s17, 64  ;;  %p1364_p12 = scmp.ne.s32.totalorder %s1358_s6, 0 }
  0x6c   : > { %p1004_p3 = scmp.ne.s32.totalorder %s665_s17, %s1003_s20  ;;  %s1093_s16 = smov [#allocation8]  }
  0x6d   : > { %s1007_s30 = sshll.u32 %s1093_s16, 4  ;;  %s1008_s30 = int_to_ptr.vmem [resolvable:$false] %s1007_s30 }
  0x6e   : > { %p1005_p10 = pnand %p1004_p3, %p1364_p12  ;;  %s1009_s23 = scalar_lea.vmem %s1008_s30, 128 }
  0x6f   : > { %p1010_p13 = scmp.lt.s32.totalorder %s665_s17, %s1008_s30  ;;  %p1011_p0 = scmp.lt.s32.totalorder %s1009_s23, %s1003_s20 }
  0x70   : > { %p1006_p2 = pneg %p1005_p10 }
  0x71   : > { %p1012_p5 = por %p1011_p0, %p1010_p13 }
  0x73   : > { %p1013_p9 = pnand %p1012_p5, %p1006_p2 }
 0x12a   : > { %v287_v5 = vpop.f32.mrf.mxu0 }
 0x12b   : > { %522 = vrot.lane.b32.xlu1 %v287_v5, %s1086_s18  ;;  %294 = vrot.lane.b32.xlu0 %v287_v5, %s1087_s4  ;;  %v1285_v6 = vpack.c.bf16 %v287_v5, %v287_v5 }
 0x12c   : > { %v803_v7 = vpop.f32.mrf.mxu0 }
 0x12d   : > { %v361_v8 = vsel %vm359_vm2, %v1285_v6, 0 }
 0x12e   : > { %v290_v9 = vpop.f32.mrf.mxu0  ;;  %806 = vmatpush3.bf16.msra.mxu1 %v361_v8 }
 0x12f   : > { %330 = vperm.xlu1 %898, %v287_v5   ;;  %408 = vrot.lane.b32.xlu0 %v287_v5, %s1088_s10 }
 0x130   : > { %v804_v10 = vpop.f32.mrf.mxu0  ;;  %817 = vmatprep.subr.bf16.mxu1 %v1082_v0 }
 0x133   : > { %900 = vset.pattern.permute.xlu1 %v1089_v11  ;;  %444 = vperm.xlu0 %899, %v287_v5  }
 0x134   : > { %558 = vperm.xlu1 %900, %v287_v5  }
 0x19d   : > { %v295_v12 = vpop.permute.xlu0 %294  ;;  %v523_v14 = vpop.permute.xlu1 %522 }
 0x19e   : > { %297 = vxpose.xlu1.b32.start.end [1/1] (short) (narrow) %v295_v12, 8 }
 0x1a1   : > { %v409_v13 = vpop.permute.xlu0 %408 }
 0x1a2   : > { %411 = vxpose.xlu0.b32.start.end [1/1] (short) (narrow) %v409_v13, 8 }
 0x1a6   : > { %525 = vxpose.xlu0.b32.start.end [1/1] (short) (narrow) %v523_v14, 8 }
 0x1aa   : > { %v331_v16 = vpop.permute.xlu1 %330 }
 0x1ae   : > { %v445_v20 = vpop.permute.xlu0 %444 }
 0x1af   : > { %v559_v18 = vpop.permute.xlu1 %558 }
 0x1cf   : > { %901 = vset.pattern.permute.xlu0 %v1089_v11 }
 0x21a   : > { %v313_v21 = vpop.trf.xlu1 }
 0x21b   : > { %v336_v22 = vrot.slane %v313_v21, %v335_v19 }
 0x21d   : > { %v337_v24 = vadd.f32 %v336_v22, %v331_v16 }
 0x21e   : > { %v427_v25 = vpop.trf.xlu0 }
 0x21f   : > { %v339_v27 = vmul.f32 0.01, %v337_v24  ;;  %v450_v28 = vrot.slane %v427_v25, %v335_v19  ;;  %vm338_vm3 = vcmp.gt.f32.partialorder %v337_v24, 0.0 }
 0x221   : > { %v451_v29 = vadd.f32 %v450_v28, %v445_v20  ;;  %v340_v30 = vsel %vm338_vm3, %v337_v24, %v339_v27 }
 0x222   : > { %v541_v31 = vpop.trf.xlu0  ;;  %v341_v32 = vadd.f32 %v340_v30, %v240_v26 }
 0x223   : > { %v453_v33 = vmul.f32 0.01, %v451_v29  ;;  %v564_v34 = vrot.slane %v541_v31, %v335_v19  ;;  %vm452_vm5 = vcmp.gt.f32.partialorder %v451_v29, 0.0 }
 0x224   : > { %v343_v35 = vsel %vm342_vm4, %v341_v32, -inf }
 0x225   : > { %v565_v36 = vadd.f32 %v564_v34, %v559_v18  ;;  %344 = vmax.xlane.f32.xlu0 %v343_v35  ;;  %v454_v37 = vsel %vm452_vm5, %v451_v29, %v453_v33 }
 0x226   : > { %v455_v38 = vadd.f32 %v454_v37, %v240_v26 }
 0x227   : > { %v567_v39 = vmul.f32 0.01, %v565_v36  ;;  %vm566_vm6 = vcmp.gt.f32.partialorder %v565_v36, 0.0 }
 0x228   : > { %v456_v40 = vsel %vm342_vm4, %v455_v38, -inf }
 0x229   : > { %457 = vmax.xlane.f32.xlu1 %v456_v40  ;;  %v568_v41 = vsel %vm566_vm6, %v565_v36, %v567_v39 }
 0x22a   : > { %v569_v42 = vadd.f32 %v568_v41, %v240_v26 }
 0x22c   : > { %v570_v43 = vsel %vm342_vm4, %v569_v42, -inf }
 0x22d   : > { %571 = vmax.xlane.f32.xlu1 %v570_v43 }
 0x2ae   : > { %v345_v44 = vpop.xlane.xlu0 %344 }
 0x2af   : > { %v346_v45 = vsub.f32 %v341_v32, %v345_v44 }
 0x2b1   : > { %v347_v46 = vmul.f32 1.442695, %v346_v45 }
 0x2b2   : > { %v458_v47 = vpop.xlane.xlu1 %457 }
 0x2b3   : > { %903 = vpow2.f32 %v347_v46  ;;  %v459_v48 = vsub.f32 %v455_v38, %v458_v47 }
 0x2b5   : > { %v460_v49 = vmul.f32 1.442695, %v459_v48 }
 0x2b6   : > { %v572_v50 = vpop.xlane.xlu1 %571 }
 0x2b7   : > { %905 = vpow2.f32 %v460_v49  ;;  %v573_v51 = vsub.f32 %v569_v42, %v572_v50 }
 0x2b9   : > { %v574_v52 = vmul.f32 1.442695, %v573_v51 }
 0x2bb   : > { %907 = vpow2.f32 %v574_v52 }
 0x2c0   : > { %v904_v53 = vpop.eup %903 }
 0x2c1   : > { %v349_v54 = vsel %vm342_vm4, %v904_v53, 0.0 }
 0x2c2   : > { %350 = vadd.xlane.f32.xlu0 %v349_v54 }
 0x2c4   : > { %v906_v55 = vpop.eup %905 }
 0x2c5   : > { %v462_v56 = vsel %vm342_vm4, %v906_v55, 0.0 }
 0x2c6   : > { %463 = vadd.xlane.f32.xlu1 %v462_v56 }
 0x2c8   : > { %v908_v57 = vpop.eup %907 }
 0x2c9   : > { %v576_v58 = vsel %vm342_vm4, %v908_v57, 0.0 }
 0x2ca   : > { %577 = vadd.xlane.f32.xlu0 %v576_v58 }
 0x2d7   : > { %469 = vrot.lane.b32.xlu1 %v1285_v6, %s1090_s7 }
 0x2e0   : > { %582 = vrot.lane.b32.xlu0 %v1285_v6, %s1091_s8 }
 0x34b   : > { %v351_v59 = vpop.xlane.xlu0 %350 }
 0x34c   : > { %909 = vrcp.f32 %v351_v59 }
 0x34f   : > { %v464_v60 = vpop.xlane.xlu1 %463 }
 0x350   : > { %911 = vrcp.f32 %v464_v60 }
 0x353   : > { %v578_v61 = vpop.xlane.xlu0 %577  ;;  %v470_v62 = vpop.permute.xlu1 %469 }
 0x354   : > { %913 = vrcp.f32 %v578_v61  ;;  %v475_v63 = vsel %vm359_vm2, %v470_v62, 0 }
 0x355   : > { %812 = vmatpush3.bf16.msra.mxu0 %v475_v63 }
 0x357   : > { %v583_v3 = vpop.permute.xlu0 %582 }
 0x358   : > { %v588_v7 = vsel %vm359_vm2, %v583_v3, 0 }
 0x359   : > { %v910_v1 = vpop.eup %909 }
 0x35a   : > { %v353_v2 = vmul.f32 %v910_v1, %v904_v53 }
 0x35c   : > { %v354_v4 = vpack.c.bf16 %v353_v2, %v353_v2 }
 0x35d   : > { %v912_v5 = vpop.eup %911 }
 0x35e   : > { %808 = vmatmul.mubr.msk.bf16.vlgmr.msra.gmra.mxu1 %vm342_vm4, %v354_v4  ;;  %v466_v6 = vmul.f32 %v912_v5, %v906_v55 }
 0x35f   : > { %818 = vmatpush3.bf16.msra.mxu1 %v588_v7  ;;  %819 = vmatprep.mubr.msk.bf16.mxu1 %vm1083_vm0, %v1082_v0 }
 0x360   : > { %v467_v8 = vpack.c.bf16 %v466_v6, %v466_v6 }
 0x361   : > { %v914_v9 = vpop.eup %913 }
 0x362   : > { %814 = vmatmul.mubr.msk.bf16.vlgmr.msra.gmra.mxu0 %vm342_vm4, %v467_v8  ;;  %v580_v10 = vmul.f32 %v914_v9, %v908_v57 }
 0x364   : > { %v581_v11 = vpack.c.bf16 %v580_v10, %v580_v10 }
 0x366   : > { %820 = vmatmul.mubr.msk.bf16.vlgmr.msra.gmra.mxu1 %vm342_vm4, %v581_v11 }
 0x41e   : > { %v397_v12 = vpop.f32.mrf.mxu1 }
 0x41f   : > { %v404_v31 = vmul.f32 1.442695, %v397_v12  ;;  %vm403_vm10 = vcmp.gt.f32.partialorder %v397_v12, 0.0 }
 0x420   : > { %v809_v13 = vpop.f32.mrf.mxu1 }
 0x422   : > { %v400_v14 = vpop.f32.mrf.mxu1  ;;  %v511_v15 = vpop.f32.mrf.mxu0 }
 0x423   : > { %v518_v16 = vmul.f32 1.442695, %v511_v15  ;;  %vm517_vm7 = vcmp.gt.f32.partialorder %v511_v15, 0.0 }
 0x424   : > { %v810_v17 = vpop.f32.mrf.mxu1  ;;  %v815_v18 = vpop.f32.mrf.mxu0 }
 0x425   : > { %915 = vpow2.f32 %v518_v16 }
 0x426   : > { %v514_v19 = vpop.f32.mrf.mxu0  ;;  %v624_v20 = vpop.f32.mrf.mxu1 }
 0x427   : > { %v631_v21 = vmul.f32 1.442695, %v624_v20  ;;  %vm630_vm8 = vcmp.gt.f32.partialorder %v624_v20, 0.0 }
 0x428   : > { %v816_v0 = vpop.f32.mrf.mxu0  ;;  %v821_v22 = vpop.f32.mrf.mxu1 }
 0x429   : > { %917 = vpow2.f32 %v631_v21 }
 0x42a   : > { %v627_v23 = vpop.f32.mrf.mxu1  ;;  %919 = vpow2.f32 %v404_v31 }
 0x42c   : > { %v822_v24 = vpop.f32.mrf.mxu1 }
 0x432   : > { %v916_v25 = vpop.eup %915 }
 0x433   : > { %v784_v26 = vadd.f32 -1.0, %v916_v25 }
 0x435   : > { %v521_v27 = vsel %vm517_vm7, %v511_v15, %v784_v26 }
 0x436   : > { %v918_v28 = vpop.eup %917  ;;  %636 = vrot.lane.b32.xlu1 %v521_v27, %s1092_s25 }
 0x437   : > { %v786_v29 = vadd.f32 -1.0, %v918_v28  ;;  %v920_v32 = vpop.eup %919 }
 0x438   : > { %v782_v33 = vadd.f32 -1.0, %v920_v32 }
 0x439   : > { %v634_v30 = vsel %vm630_vm8, %v624_v20, %v786_v29 }
 0x43a   : > { %640 = vrot.lane.b32.xlu1 %v634_v30, %s1091_s8  ;;  %v407_v35 = vsel %vm403_vm10, %v397_v12, %v782_v33 }
 0x4a8   : > { %v637_v34 = vpop.permute.xlu1 %636 }
 0x4a9   : > { %v644_v36 = vsel %vm643_vm9, %v407_v35, %v637_v34 }
 0x4ac   : > { %v641_v37 = vpop.permute.xlu1 %640 }
 0x4ad   : > { %v646_v38 = vsel %vm645_vm11, %v644_v36, %v641_v37 }
 0x4ae   : > { %v647_v39 = vpack.c.bf16 %v646_v38, %v646_v38 }
 0x4b0   : > { %649 = vst.msk [vmem:[%s236_s9] sm:$0xf] %vm648_vm12, %v647_v39 }
 0x4b1   : > { %1016 = shalt.err (!%p1013_p9)
}
 0x4b2   : > { %s1017_s27 = scalar_lea.hbm %s662_s11, 64  ;;  %s1021_s4 = scalar_lea.hbm %s1348_s3, 128 }
 0x4b3   : > { %p1018_p1 = scmp.ne.s32.totalorder %s662_s11, %s1017_s27  ;;  %p1022_p7 = scmp.lt.s32.totalorder %s662_s11, %s1348_s3 }
 0x4b4   : > { %p1023_p11 = scmp.lt.s32.totalorder %s1021_s4, %s1017_s27 }
 0x4b5   : > { %p1019_p4 = pnand %p1018_p1, %p1364_p12 }
 0x4b6   : > { %p1024_p8 = por %p1023_p11, %p1022_p7 }
 0x4b7   : > { %p1020_p6 = pneg %p1019_p4 }
 0x4b9   : > { %p1025_p3 = pnand %p1024_p8, %p1020_p6 }
 0x4bb   : > { %1028 = shalt.err (!%p1025_p3)
}
 0x4bc   : > { %831 = dma.vmem_to_hbm [thread:$0]  (%p1364_p12), %s665_s17, 64, %s662_s11, %s651_s21  }
 0x4bd PF: > { %s676_s8 = sand.u32 1, %s1063_s12   ;;  %p1365_p10 = scmp.ne.s32.totalorder %s1354_s19, 0 }
 0x4be   : > { %p1366_p2 = scmp.ge.s32.totalorder %s1075_s15, 2  ;;  %s677_s25 = scalar_lea.sflag [#allocation4], %s676_s8 }
 0x4c0   : > { %p845_p13 = pnand %p1366_p2, %p1365_p10 }
 0x4c2   : > { %p846_p0 = pneg %p845_p13 }
 0x4c4   : > { %1058 = dma.done.wait (%p846_p0), %s677_s25, 64  }
 0x4c5   : > { %1060 = vsyncadd (%p846_p0), %s677_s25, 4294967232  ;;  %p19_p5 = scmp.ge.s32.totalorder %s1168_s24, 4   ;;  %s1367_s12 = smov %s1067_s13 }
 0x4c6   : > { %s1368_s13 = smov %s1071_s14  ;;  %s1369_s14 = smov %s1185_s5 }
 0x4c7   : > { %s1370_s15 = smov %s1168_s24  ;;  %21 = sbr.rel (!%p19_p5) target bundleno = 7 (0x7), region = 94 }
 0x4cc   :  { %682 = vsyncpa [#allocation3], 1 }
 0x4cd   :  { %684 = vsyncpa [#allocation3 + $0x1], 1 }
 0x4ce   :  { %685 = vsyncpa [#allocation6], 1 }
 0x4cf   :  { %687 = vsyncpa [#allocation6 + $0x1], 1 }
 0x4d0   :  { %688 = vsyncpa [#allocation4], 1 }
 0x4d1   :  { %690 = vsyncpa [#allocation4 + $0x1], 1 }

</bundles_post_ra>
